<compile_context>
chip_gen: v5e
topology: v5e:2x2
jax: 0.10.0
libtpu: 0.0.40
codegen_flags: <defaults>
</compile_context>

<pallas_src>
import functools
import math

import jax
import jax.numpy as jnp
from jax.experimental import pallas as pl
from jax.experimental.pallas import tpu as pltpu


# ----------------------------- kernels -----------------------------

def _qkv_proj_kernel(x_ref, w_ref, b_ref, qkv_ref):
    # x_ref: (1, bs, D) bf16 | w_ref: (D, bn) bf16 | b_ref: (1, bn) f32
    # qkv_ref: (1, bs, bn) bf16
    acc = jnp.dot(x_ref[0], w_ref[...], preferred_element_type=jnp.float32)
    qkv_ref[0] = (acc + b_ref[...]).astype(qkv_ref.dtype)


def _attention_kernel(q_ref, k_ref, v_ref, wo_ref, bo_ref, out_ref, *rest,
                      num_heads, valid_len):
    # q_ref: (1, H, bq, hd) bf16   (1/sqrt(hd) already folded into Wqkv)
    # k_ref, v_ref: (1, H, Sp, hd) bf16
    # wo_ref: (H, hd, D) bf16 | bo_ref: (1, D) f32
    # out_ref: (1, bq, D) f32 | optional scores_ref: (1, H, bq, Sp)
    # acc_ref scratch: (bq, D) f32
    if len(rest) == 2:
        scores_ref, acc_ref = rest
    else:
        scores_ref = None
        (acc_ref,) = rest

    block_q = q_ref.shape[2]
    padded_len = k_ref.shape[2]

    # Mask for padded key columns (static pattern; only built when padded).
    if padded_len != valid_len:
        key_idx = jax.lax.broadcasted_iota(jnp.int32, (block_q, padded_len), 1)
        key_mask = key_idx < valid_len
    else:
        key_mask = None

    acc_ref[...] = jnp.zeros_like(acc_ref)

    @pl.loop(0, num_heads)
    def _per_head(h):
        q = q_ref[0, h]                       # (bq, hd) bf16
        k = k_ref[0, h]                       # (Sp, hd) bf16
        v = v_ref[0, h]                       # (Sp, hd) bf16

        # scores: (bq, Sp), bf16 operands with f32 accumulation on the MXU
        s = jax.lax.dot_general(q, k, (((1,), (1,)), ((), ())),
                                preferred_element_type=jnp.float32)
        if key_mask is not None:
            s = jnp.where(key_mask, s, -1e30)

        # numerically-stable softmax in f32; exact reciprocal on the tiny
        # (bq, 1) denominator so returned probabilities match torch.softmax
        m = jnp.max(s, axis=-1, keepdims=True)
        e = jnp.exp(s - m)
        denom = jnp.sum(e, axis=-1, keepdims=True)
        p = e * pl.reciprocal(denom, approx=False)

        if scores_ref is not None:
            scores_ref[0, h] = p.astype(scores_ref.dtype)

        # per-head context (bq, hd), then push through this head's slice of
        # the out_proj weight; head reduction via the f32 scratch accumulator
        ctx = jnp.dot(p.astype(jnp.bfloat16), v,
                      preferred_element_type=jnp.float32)
        acc_ref[...] += jnp.dot(ctx.astype(jnp.bfloat16), wo_ref[h],
                                preferred_element_type=jnp.float32)

    out_ref[0] = (acc_ref[...] + bo_ref[...]).astype(out_ref.dtype)


# ----------------------------- wrapper -----------------------------

_VMEM_LIMIT = 48 * 1024 * 1024  # headroom on v5e/v6e (128 MiB) and v7x (64 MiB)


def _round_up(x, m):
    return (x + m - 1) // m * m


def _default_block_n(total, target=1536):
    """Largest multiple-of-128 divisor of `total` (<= target), else full."""
    if total <= target or total % 128 != 0:
        return total
    for cand in range(target, 127, -128):
        if total % cand == 0:
            return cand
    return total


def siglip_attention(hidden_state, params, *, num_heads,
                     block_q=None, block_s=None, block_n=None,
                     output_scores=True, scores_dtype=None):
    """SiglipAttention forward.

    hidden_state: (B, S, D) float32.
    params (column-major convention, i.e. already-transposed Linear weights):
      wqkv: (D, 3D), bqkv: (3D,) or (1, 3D), wo: (D, D), bo: (D,) or (1, D).
    Returns (out, scores) like the PyTorch module; scores is None when
    output_scores=False. Pass scores_dtype=jnp.bfloat16 to halve the
    attention-probability writeback.
    """
    B, S, D = hidden_state.shape
    H = num_heads
    assert D % H == 0
    hd = D // H
    scale = float(hd) ** -0.5
    scores_dtype = scores_dtype or hidden_state.dtype

    block_q = block_q or min(128, _round_up(S, 8))
    block_s = block_s or block_q
    block_n = block_n or _default_block_n(3 * D)
    assert block_q % 8 == 0 and block_s % 8 == 0
    assert (3 * D) % block_n == 0

    # Pad S so both kernels tile evenly; padded key columns are masked.
    Sp = _round_up(S, math.lcm(block_q, block_s))
    pad = Sp - S
    x = hidden_state
    if pad:
        x = jnp.pad(x, ((0, 0), (0, pad), (0, 0)))
    x_bf = x.astype(jnp.bfloat16)

    # ---- host-side param prep: fold 1/sqrt(hd) into Q columns, cast bf16 ----
    col_scale = jnp.concatenate(
        [jnp.full((D,), scale, jnp.float32), jnp.ones((2 * D,), jnp.float32)])
    wqkv = (params["wqkv"].astype(jnp.float32) * col_scale).astype(jnp.bfloat16)
    bqkv = params["bqkv"].astype(jnp.float32).reshape(1, 3 * D) * col_scale
    wo_heads = params["wo"].astype(jnp.bfloat16).reshape(H, hd, D)
    bo = params["bo"].astype(jnp.float32).reshape(1, D)

    # ---- kernel 1: fused QKV projection, tiled over (batch, seq, out-cols) ----
    qkv = pl.pallas_call(
        _qkv_proj_kernel,
        out_shape=jax.ShapeDtypeStruct((B, Sp, 3 * D), jnp.bfloat16),
        grid=(B, Sp // block_s, (3 * D) // block_n),
        in_specs=[
            pl.BlockSpec((1, block_s, D), lambda b, s, n: (b, s, 0)),
            pl.BlockSpec((D, block_n), lambda b, s, n: (0, n)),
            pl.BlockSpec((1, block_n), lambda b, s, n: (0, n)),
        ],
        out_specs=pl.BlockSpec((1, block_s, block_n), lambda b, s, n: (b, s, n)),
        compiler_params=pltpu.CompilerParams(
            dimension_semantics=("parallel", "parallel", "parallel"),
            vmem_limit_bytes=_VMEM_LIMIT),
        cost_estimate=pl.CostEstimate(
            flops=2 * B * Sp * D * 3 * D,
            transcendentals=0,
            bytes_accessed=2 * (B * Sp * D + D * 3 * D + B * Sp * 3 * D)
                           + 4 * 3 * D),
    )(x_bf, wqkv, bqkv)

    # ---- head split / head-major layout plumbing (plain XLA, all bf16) ----
    q, k, v = jnp.split(qkv, 3, axis=-1)
    q = q.reshape(B, Sp, H, hd).transpose(0, 2, 1, 3)   # (B, H, Sp, hd)
    k = k.reshape(B, Sp, H, hd).transpose(0, 2, 1, 3)
    v = v.reshape(B, Sp, H, hd).transpose(0, 2, 1, 3)

    # ---- kernel 2: attention + folded out_proj, tiled over (batch, q-tile) ----
    kern = functools.partial(_attention_kernel, num_heads=H, valid_len=S)

    out_shapes = [jax.ShapeDtypeStruct((B, Sp, D), jnp.float32)]
    out_specs = [pl.BlockSpec((1, block_q, D), lambda b, qi: (b, qi, 0))]
    if output_scores:
        out_shapes.append(jax.ShapeDtypeStruct((B, H, Sp, Sp), scores_dtype))
        out_specs.append(
            pl.BlockSpec((1, H, block_q, Sp), lambda b, qi: (b, 0, qi, 0)))

    attn_flops = 4 * B * H * Sp * Sp * hd + 2 * B * Sp * D * D
    attn_bytes = (2 * (3 * B * H * Sp * hd + H * hd * D)
                  + 4 * (B * Sp * D + D)
                  + (jnp.dtype(scores_dtype).itemsize * B * H * Sp * Sp
                     if output_scores else 0))

    results = pl.pallas_call(
        kern,
        out_shape=tuple(out_shapes),
        grid=(B, Sp // block_q),
        in_specs=[
            pl.BlockSpec((1, H, block_q, hd), lambda b, qi: (b, 0, qi, 0)),
            pl.BlockSpec((1, H, Sp, hd), lambda b, qi: (b, 0, 0, 0)),
            pl.BlockSpec((1, H, Sp, hd), lambda b, qi: (b, 0, 0, 0)),
            pl.BlockSpec((H, hd, D), lambda b, qi: (0, 0, 0)),
            pl.BlockSpec((1, D), lambda b, qi: (0, 0)),
        ],
        out_specs=tuple(out_specs),
        scratch_shapes=[pltpu.VMEM((block_q, D), jnp.float32)],
        compiler_params=pltpu.CompilerParams(
            dimension_semantics=("parallel", "parallel"),
            vmem_limit_bytes=_VMEM_LIMIT),
        cost_estimate=pl.CostEstimate(
            flops=attn_flops,
            transcendentals=B * H * Sp * Sp,
            bytes_accessed=attn_bytes),
    )(q, k, v, wo_heads, bo)

    if output_scores:
        out_p, scores_p = results
        scores = scores_p[:, :, :S, :S]
    else:
        (out_p,) = results
        scores = None
    return out_p[:, :S, :], scores


# ----------------------------- reference -----------------------------

def _reference(hidden_state, params, num_heads):
    B, S, D = hidden_state.shape
    H = num_heads
    hd = D // H
    qkv = hidden_state @ params["wqkv"] + params["bqkv"].reshape(1, 1, 3 * D)
    q, k, v = jnp.split(qkv, 3, axis=-1)
    q = q.reshape(B, S, H, hd).transpose(0, 2, 1, 3)
    k = k.reshape(B, S, H, hd).transpose(0, 2, 1, 3)
    v = v.reshape(B, S, H, hd).transpose(0, 2, 1, 3)
    s = jnp.einsum("bhqd,bhkd->bhqk", q, k) * (float(hd) ** -0.5)
    p = jax.nn.softmax(s, axis=-1)
    ctx = jnp.einsum("bhqk,bhkd->bhqd", p, v)
    ctx = ctx.transpose(0, 2, 1, 3).reshape(B, S, D)
    out = ctx @ params["wo"] + params["bo"].reshape(1, 1, D)
    return out, p


# ----------------------------- main -----------------------------

if __name__ == "__main__":
    # Small SiglipVisionConfig-like shapes: hidden=32, 4 heads (head_dim=8),
    # batch=2, seq=12.  S=12 is deliberately not a multiple of the 8-row
    # tiles so the padding + key-masking path is exercised (as for the real
    # SigLIP sequence lengths 196 / 729).
    B, S, D, H = 2, 12, 32, 4

    key = jax.random.PRNGKey(0)
    kx, kw, kb, kwo, kbo = jax.random.split(key, 5)
    hidden_state = jax.random.normal(kx, (B, S, D), jnp.float32)
    params = {
        "wqkv": 0.02 * jax.random.normal(kw, (D, 3 * D), jnp.float32),
        "bqkv": 0.02 * jax.random.normal(kb, (3 * D,), jnp.float32),
        "wo": 0.02 * jax.random.normal(kwo, (D, D), jnp.float32),
        "bo": 0.02 * jax.random.normal(kbo, (D,), jnp.float32),
    }

    out, scores = siglip_attention(hidden_state, params, num_heads=H,
                                   block_q=8, block_s=8)
    out, scores = jax.block_until_ready((out, scores))

    assert out.shape == (B, S, D), out.shape
    assert scores.shape == (B, H, S, S), scores.shape
    # softmax rows (valid keys only) must sum to ~1 (exact reciprocal)
    assert jnp.allclose(jnp.sum(scores, axis=-1), 1.0, atol=2e-3)

    # compare against a pure-JAX f32 reference (bf16 matmul tolerance)
    out_ref, scores_ref = _reference(hidden_state, params, H)
    assert jnp.allclose(out, out_ref, atol=5e-3), float(
        jnp.max(jnp.abs(out - out_ref)))
    assert jnp.allclose(scores, scores_ref, atol=5e-3), float(
        jnp.max(jnp.abs(scores - scores_ref)))

    print("KERNEL_OK")
</pallas_src>

<mosaic_0001>
module attributes {stable_mosaic.version = 11 : i64} {
  func.func @_qkv_proj_kernel(%arg0: i32, %arg1: i32, %arg2: i32, %arg3: memref<1x8x32xbf16, #tpu.memory_space<vmem>>, %arg4: memref<32x96xbf16, #tpu.memory_space<vmem>>, %arg5: memref<1x96xf32, #tpu.memory_space<vmem>>, %arg6: memref<1x8x96xbf16, #tpu.memory_space<vmem>>) attributes {dimension_semantics = [#tpu.dimension_semantics<parallel>, #tpu.dimension_semantics<parallel>, #tpu.dimension_semantics<parallel>], iteration_bounds = array<i64: 2, 2, 1>, scalar_prefetch = 0 : i64, scratch_operands = 0 : i64, tpu.core_type = #tpu.core_type<tc>, window_params = [{transform_indices = @transform_0, window_bounds = array<i64: 1, 8, 32>}, {transform_indices = @transform_1, window_bounds = array<i64: 32, 96>}, {transform_indices = @transform_2, window_bounds = array<i64: 1, 96>}, {transform_indices = @transform_3, window_bounds = array<i64: 1, 8, 96>}]} {
    %c0 = arith.constant 0 : index
    %c0_0 = arith.constant 0 : index
    %c0_1 = arith.constant 0 : index
    %0 = vector.load %arg3[%c0, %c0_0, %c0_1] : memref<1x8x32xbf16, #tpu.memory_space<vmem>>, vector<1x8x32xbf16>
    %1 = vector.shape_cast %0 : vector<1x8x32xbf16> to vector<8x32xbf16>
    %c0_2 = arith.constant 0 : index
    %c0_3 = arith.constant 0 : index
    %2 = vector.load %arg4[%c0_2, %c0_3] : memref<32x96xbf16, #tpu.memory_space<vmem>>, vector<32x96xbf16>
    %cst = arith.constant dense<0.000000e+00> : vector<8x96xf32>
    %3 = tpu.matmul %1, %2, %cst {dimension_numbers = #tpu.dot_dimension_numbers<[1], [0], [0], [1], [0, 0, 1, 1], [], []>} : vector<8x32xbf16>, vector<32x96xbf16>, vector<8x96xf32> -> vector<8x96xf32>
    %c0_4 = arith.constant 0 : index
    %c0_5 = arith.constant 0 : index
    %4 = vector.load %arg5[%c0_4, %c0_5] : memref<1x96xf32, #tpu.memory_space<vmem>>, vector<1x96xf32>
    %5 = vector.broadcast %4 : vector<1x96xf32> to vector<8x96xf32>
    %6 = arith.addf %3, %5 : vector<8x96xf32>
    %7 = arith.truncf %6 : vector<8x96xf32> to vector<8x96xbf16>
    %c0_6 = arith.constant 0 : index
    %c0_7 = arith.constant 0 : index
    %c0_8 = arith.constant 0 : index
    %8 = vector.load %arg6[%c0_6, %c0_7, %c0_8] : memref<1x8x96xbf16, #tpu.memory_space<vmem>>, vector<1x8x96xbf16>
    %9 = vector.shape_cast %8 : vector<1x8x96xbf16> to vector<8x96xbf16>
    %10 = vector.shape_cast %7 : vector<8x96xbf16> to vector<1x8x96xbf16>
    tpu.vector_store %arg6[%c0_6, %c0_7, %c0_8], %10 {strides = array<i32>} : memref<1x8x96xbf16, #tpu.memory_space<vmem>>, vector<1x8x96xbf16>,
    return
  }
  func.func @transform_0(%arg0: i32, %arg1: i32, %arg2: i32) -> (i32, i32, i32) {
    %c0_i32 = arith.constant 0 : i32
    %c0_i32_0 = arith.constant 0 : i32
    return %arg0, %arg1, %c0_i32 : i32, i32, i32
  }
  func.func @transform_1(%arg0: i32, %arg1: i32, %arg2: i32) -> (i32, i32) {
    %c0_i32 = arith.constant 0 : i32
    %c0_i32_0 = arith.constant 0 : i32
    return %c0_i32, %arg2 : i32, i32
  }
  func.func @transform_2(%arg0: i32, %arg1: i32, %arg2: i32) -> (i32, i32) {
    %c0_i32 = arith.constant 0 : i32
    %c0_i32_0 = arith.constant 0 : i32
    return %c0_i32, %arg2 : i32, i32
  }
  func.func @transform_3(%arg0: i32, %arg1: i32, %arg2: i32) -> (i32, i32, i32) {
    %c0_i32 = arith.constant 0 : i32
    return %arg0, %arg1, %arg2 : i32, i32, i32
  }
}

</mosaic_0001>

<bundles_post_ra>
// kernel: tpu_custom_call.1
= control target key start
LH: loop header
LB: loop body
LE: loop exit
PB: predicated region body
PF: predicated region fallthrough
CT: control target
= control target key end

     0   :  { %s903_s0 = inlined_call_operand.hbm [shape: bf16[2,16,32], index: 0, kind: input, shape index: {}]   ;;  %s904_s1 = inlined_call_operand.hbm [shape: bf16[32,96], index: 1, kind: input, shape index: {}]   ;;  %s905_s2 = inlined_call_operand.vmem [shape: f32[1,96], index: 2, kind: input, shape index: {}]   ;;  %s906_s3 = inlined_call_operand.hbm [shape: bf16[2,16,96], index: 3, kind: output, shape index: {}]  }
   0x1   :  { %911 = sst [smem:[#allocation15_spill]] %s904_s1 }
   0x2   :  { %8 = vsyncpa [#allocation3], 0 }
   0x3   :  { %10 = vsyncpa [#allocation3 + $0x1], 0 }
   0x4   :  { %11 = vsyncpa [#allocation6], 0 }
   0x5   :  { %12 = vsyncpa [#allocation4], 0 }
   0x6   :  { %14 = vsyncpa [#allocation4 + $0x1], 0  ;;  %s735_s12 = smov 0   ;;  %s737_s13 = smov 0  }
   0x7   :  { %s739_s14 = smov 0   ;;  %s741_s15 = smov 0  }
   0x8   :  { %s743_s16 = smov 0   ;;  %s745_s17 = smov 0  }
   0x9   :  { %s747_s18 = smov 0   ;;  %s749_s19 = smov 0  }
   0xa LB: > { %912 = sst [smem:[#allocation11_spill]] %s682_s12  ;;  %s427_s20 = sadd.s32 4294967295, %s710_s19   ;;  %s710_s19 = sphi %s749_s19, %s20_s19   ;;  %s706_s18 = sphi %s747_s18, %s933_s18   ;;  %s702_s17 = sphi %s745_s17, %s932_s17   ;;  %s698_s16 = sphi %s743_s16, %s931_s16   ;;  %s694_s15 = sphi %s741_s15, %s930_s15   ;;  %s690_s14 = sphi %s739_s14, %s929_s14   ;;  %s686_s13 = sphi %s737_s13, %s928_s13   ;;  %s682_s12 = sphi %s735_s12, %s927_s12  }
   0xb   : > { %p429_p0 = scmp.ge.s32.totalorder %s710_s19, 1  ;;  %p777_p1 = scmp.eq.s32.totalorder %s427_s20, 0 }
   0xc   : > { %p154_p2 = scmp.lt.s32.totalorder %s710_s19, 5  ;;  %s914_s1 = sld [smem:[#allocation15_spill]] }
   0xd   : > { %s712_s26 = smov [#allocation5]   ;;  %s713_s28 = smov 64  }
   0xe   : > { %p785_p3 = pnand %p429_p0, %p154_p2  ;;  %s169_s27 = sshll.u32 %s712_s26, 4  ;;  %s170_s27 = int_to_ptr.vmem [resolvable:$true] %s169_s27 }
   0xf   : > { %s714_s29 = smov 4   ;;  %s428_s30 = sadd.s32 4294967294, %s710_s19  }
  0x10   : > { %p464_p4 = pneg %p785_p3  ;;  %s35_s4 = sadd.s32 1, %s702_s17 }
  0x11   : > { %s39_s5 = sadd.s32 1, %s706_s18  ;;  %p37_p6 = scmp.ge.s32.totalorder %s35_s4, 2 }
  0x12   : > { %s167_s24 = sshll.u32 %s914_s1, 4  ;;  %p465_p5 = pnand %p464_p4, %p777_p1  ;;  %s168_s24 = int_to_ptr.hbm [resolvable:$true] %s167_s24 }
  0x13   : > { %s48_s6 = sadd.s32 1, %s690_s14  ;;  %p55_p7 = scmp.ne.s32.totalorder %s690_s14, %s686_s13 }
  0x14   : > { %467 = dma.hbm_to_vmem [thread:$0]  (!%p465_p5), %s168_s24, 256, %s170_s27, [#allocation6], %s713_s28, %s713_s28, %s714_s29  }
  0x15   : > { %p56_p8 = scmp.eq.s32.totalorder %s710_s19, 0  ;;  %s935_s4 = smov (%p37_p6, %s35_s4), 0 }
  0x16   : > { %916 = sst [smem:[#allocation12_spill]] %s935_s4  ;;  %s937_s5 = smov (!%p37_p6, %s39_s5), %s706_s18 }
  0x17   : > { %s44_s7 = ssub.s32 %s702_s17, %s935_s4  ;;  %p805_p9 = por %p56_p8, %p55_p7 }
  0x18   : > { %p41_p10 = scmp.ge.s32.totalorder %s937_s5, 2  ;;  %p61_p11 = scmp.ne.s32.totalorder %s686_s13, %s682_s12 }
  0x19   : > { %p141_p12 = scmp.eq.s32.totalorder %s427_s20, 3  ;;  %p147_p13 = scmp.eq.s32.totalorder %s428_s30, 3 }
  0x1a   : > { %s939_s5 = smov (%p41_p10, %s937_s5), 0  ;;  %p815_p0 = por %p777_p1, %p61_p11 }
  0x1b   : > { %918 = sst [smem:[#allocation13_spill]] %s939_s5  ;;  %p819_p2 = por %p141_p12, %p55_p7 }
  0x1c   : > { %s43_s11 = ssub.s32 %s706_s18, %s939_s5  ;;  %p825_p4 = por %p147_p13, %p61_p11 }
  0x1d   : > { %s45_s20 = sor.u32 %s44_s7, %s43_s11  ;;  %p477_p5 = scmp.lt.s32.totalorder %s710_s19, 4 }
  0x1e   : > { %s921_s22 = scalar_select %p825_p4, 1, 0 }
  0x1f   : > { %p46_p6 = scmp.eq.s32.totalorder %s45_s20, 0  ;;  %s189_s23 = sand.u32 1, %s690_s14  }
  0x20   : > { %922 = sst [smem:[#allocation14_spill]] %s921_s22  ;;  %s433_s24 = sshll.u32 %s189_s23, 2 }
  0x21   : > { %s832_s26 = scalar_select %p46_p6, %s690_s14, %s48_s6  }
  0x22   : > { %s434_s27 = sshll.u32 %s706_s18, 1  ;;  %s193_s29 = scalar_lea.vmem [#allocation2], %s433_s24 }
  0x23   : > { %s197_s28 = sadd.s32 %s702_s17, %s434_s27  ;;  %s203_s30 = sshll.u32 %s193_s29, 4  ;;  %s204_s30 = int_to_ptr.vmem [resolvable:$true] %s203_s30 }
  0x24   : > { %s435_s1 = sshll.u32 %s197_s28, 2  ;;  %p469_p7 = pnand %p477_p5, %p805_p9 }
  0x25   : > { %s199_s5 = scalar_lea.hbm %s903_s0, %s435_s1  ;;  %s190_s7 = scalar_lea.sflag [#allocation3], %s189_s23 }
  0x26   : > { %s201_s22 = sshll.u32 %s199_s5, 4  ;;  %212 = sbr.rel (%p785_p3) target bundleno = 188 (0xbc), region = 32  ;;  %s202_s22 = int_to_ptr.hbm [resolvable:$true] %s201_s22 }
  0x27   : > { %471 = dma.hbm_to_vmem [thread:$0]  (!%p469_p7), %s202_s22, 64, %s204_s30, %s190_s7  }
  0x28   : > { %s844_s6 = sand.u32 (!%p785_p3), 1, %s686_s13  }
  0x29   : > { %s437_s11 = sshll.u32 (!%p785_p3), %s844_s6, 2  ;;  %s215_s20 = scalar_lea.sflag (!%p785_p3), [#allocation3], %s844_s6 }
  0x2a   : > { %s218_s24 = scalar_lea.vmem (!%p785_p3), [#allocation2], %s437_s11 }
  0x2b   : > { %669 = dma.done.wait (%p815_p0), %s215_s20, 64  }
  0x2c   : > { %671 = vsyncadd (%p815_p0), %s215_s20, 4294967232 }
  0x2d   : > { %673 = dma.done.wait (%p777_p1), [#allocation6], 256  }
  0x2e   : > { %675 = vsyncadd (%p777_p1), [#allocation6], 4294967040  ;;  %v455_v0 = vld [vmem:[#allocation5 + $0x8] sm:$0xff]  ;;  %v454_v1 = vld [vmem:[#allocation5] sm:$0xff]  ;;  %vm275_vm0 = vcmask 261120   ;;  %s450_s1 = sshll.u32 %s698_s16, 1 }
  0x2f   : > { %285 = vmatpush.bf16.msra.mxu0 %v455_v0  ;;  %v254_v2 = vld [vmem:[%s218_s24] sm:$0xf]  ;;  %s307_s12 = sadd.s32 %s694_s15, %s450_s1  ;;  %s249_s22 = scalar_lea.vmem [#allocation7], %s437_s11  ;;  %vm293_vm1 = vcmask 781312  }
  0x30   : > { %s451_s25 = sshll.u32 %s307_s12, 2  ;;  %v547_v3 = vld [vmem:[%s905_s2] ss:$0 sm:$0xff]  ;;  %s311_s23 = sshll.u32 %s249_s22, 4  ;;  %s312_s23 = int_to_ptr.vmem [resolvable:$true] %s311_s23 }
  0x31   : > { %s309_s9 = scalar_lea.hbm %s906_s3, %s451_s25  ;;  %s296_s15 = scalar_lea.sflag [#allocation4], %s844_s6 }
  0x32   : > { %s313_s27 = sshll.u32 %s309_s9, 4  ;;  %s628_s7 = scalar_lea.hbm %s906_s3, 16  ;;  %s314_s27 = int_to_ptr.hbm [resolvable:$true] %s313_s27 }
  0x33   : > { %286 = vmatpush.bf16.msra.mxu0 %v454_v1  ;;  %s622_s16 = sshra.s32 %s314_s27, 4  ;;  %s623_s16 = int_to_ptr.hbm [resolvable:$true] %s622_s16 }
  0x34   : > { %s624_s28 = scalar_lea.hbm %s623_s16, 4  ;;  %p629_p9 = scmp.lt.s32.totalorder %s623_s16, %s906_s3 }
  0x35   : > { %p625_p1 = scmp.ne.s32.totalorder %s623_s16, %s624_s28  ;;  %p630_p10 = scmp.lt.s32.totalorder %s628_s7, %s624_s28 }
  0x36   : > { %448 = vmatmul.msk.bf16.vlgmr.msra.gmra.mxu0 %vm275_vm0, %v254_v2 }
  0x37   : > { %p626_p3 = pnand %p625_p1, %p819_p2  ;;  %p631_p11 = por %p630_p10, %p629_p9 }
  0x39   : > { %p627_p8 = pneg %p626_p3 }
  0x3b   : > { %p632_p12 = pnand %p631_p11, %p627_p8 }
  0xb3   : > { %v288_v4 = vpop.f32.mrf.mxu0 }
  0xb4   : > { %v289_v5 = vadd.f32 %v547_v3, %v288_v4 }
  0xb6   : > { %v292_v6 = vpack.c.bf16 %v289_v5, %v289_v5 }
  0xb8   : > { %294 = vst.msk [vmem:[%s249_s22] sm:$0xf] %vm293_vm1, %v292_v6 }
  0xb9   : > { %635 = shalt.err (!%p632_p12)
}
  0xba   : > { %462 = dma.vmem_to_hbm [thread:$0]  (%p819_p2), %s312_s23, 64, %s314_s27, %s296_s15  }
  0xbb   : > { %v290_v7 = vpop.f32.mrf.mxu0 }
  0xbc PF: > { %s923_s6 = sld [smem:[#allocation11_spill]]  ;;  %p479_p13 = scmp.ge.s32.totalorder %s710_s19, 2 }
  0xbe   : > { %p473_p0 = pnand %p479_p13, %p825_p4 }
  0xc0   : > { %p474_p5 = pneg %p473_p0 }
  0xc2   : > { %s325_s1 = sand.u32 1, %s923_s6  }
  0xc3   : > { %s326_s12 = scalar_lea.sflag [#allocation4], %s325_s1 }
  0xc4   : > { %677 = dma.done.wait (%p474_p5), %s326_s12, 64  }
  0xc5   : > { %679 = vsyncadd (%p474_p5), %s326_s12, 4294967232  ;;  %s20_s19 = sadd.s32 1, %s710_s19   ;;  %s925_s10 = sld [smem:[#allocation12_spill]] }
  0xc6   : > { %p17_p6 = scmp.ge.s32.totalorder %s20_s19, 6   ;;  %s926_s25 = sld [smem:[#allocation13_spill]] }
  0xc7   : > { %s927_s12 = smov %s686_s13  ;;  %s928_s13 = smov %s690_s14 }
  0xc8   : > { %s929_s14 = smov %s832_s26  ;;  %s930_s15 = smov %s702_s17 }
  0xc9   : > { %s931_s16 = smov %s706_s18  ;;  %19 = sbr.rel (!%p17_p6) target bundleno = 10 (0xa), region = 85 }
  0xcb   : > { %s932_s17 = smov %s925_s10 }
  0xcc   : > { %s933_s18 = smov %s926_s25 }
  0xce   :  { %332 = vsyncpa [#allocation3], 1 }
  0xcf   :  { %334 = vsyncpa [#allocation3 + $0x1], 1 }
  0xd0   :  { %335 = vsyncpa [#allocation6], 1 }
  0xd1   :  { %336 = vsyncpa [#allocation4], 1 }
  0xd2   :  { %338 = vsyncpa [#allocation4 + $0x1], 1 }

</bundles_post_ra>
